<compile_context>
chip_gen: v7x
topology: tpu7x:2x2x1
jax: 0.10.0
libtpu: 0.0.40
codegen_flags: <defaults>
</compile_context>

<pallas_src>
import functools

import jax
import jax.numpy as jnp
from jax.experimental import pallas as pl
from jax.experimental.pallas import tpu as pltpu


def _discounted_mse_kernel(ft_ref, hist_ref, out_ref, *, weights, inv_n):
    # ft_ref:   (1, N)  VMEM, current features
    # hist_ref: (H, N)  VMEM, stored history (oldest-first)
    # weights:  tuple of H Python floats, discount^(h-k) for stored entry k
    #           (i.e. the reversed-iteration discounting of the module),
    #           baked as immediates at trace time.
    # out_ref:  (1, 1)  SMEM scalar loss
    h = hist_ref.shape[0]
    hist = hist_ref[...]                        # single (H, N) vector load
    ft = ft_ref[...]                            # (1, N)
    diff = ft - hist                            # broadcast over sublanes -> (H, N)
    sq = diff * diff                            # one VPU op for all rows
    # Apply per-row weights as scalar immediates, accumulate rows, then do a
    # single XLU cross-lane reduce (instead of one reduce per history entry).
    acc = sq[0:1, :] * weights[0]
    for k in range(1, h):                       # H is tiny (<= max_history) -> unrolled
        acc = acc + sq[k:k + 1, :] * weights[k]
    out_ref[0, 0] = jnp.sum(acc) * inv_n        # mean over true N


def discounted_history_loss(ft_x, history_stack, discount_factor=0.9):
    """Pallas implementation of DiscountedHistoryLoss.forward.

    ft_x:          (N,) float32 current features
    history_stack: (H, N) float32, stored oldest-first (like self.history)
    Returns scalar f32: sum_i discount^(i+1) * mse(ft_x, history[::-1][i]).
    """
    n = ft_x.shape[-1]
    h = history_stack.shape[0]
    if h == 0:
        # Empty history: the PyTorch loop contributes nothing.
        return jnp.float32(0.0)

    # history[::-1][i] gets discount^(i+1); in stored (oldest-first) order,
    # entry k gets discount^(h-k). Python floats -> compile-time immediates.
    weights = tuple(float(discount_factor) ** (h - k) for k in range(h))

    ft_2d = ft_x.astype(jnp.float32).reshape(1, n)
    hist_2d = history_stack.astype(jnp.float32)

    out = pl.pallas_call(
        functools.partial(_discounted_mse_kernel, weights=weights, inv_n=1.0 / n),
        out_shape=jax.ShapeDtypeStruct((1, 1), jnp.float32),
        in_specs=[
            pl.BlockSpec(memory_space=pltpu.MemorySpace.VMEM),   # ft   (1, N)
            pl.BlockSpec(memory_space=pltpu.MemorySpace.VMEM),   # hist (H, N)
        ],
        out_specs=pl.BlockSpec(memory_space=pltpu.MemorySpace.SMEM),
        cost_estimate=pl.CostEstimate(
            flops=3 * h * n,
            bytes_accessed=4 * (h + 1) * n + 4,
            transcendentals=0,
        ),
    )(ft_2d, hist_2d)
    return out[0, 0]


if __name__ == "__main__":
    # Deterministic parameter / state setup mirroring module __init__:
    #   self.history = [relu(linspace(-10, 10, 100))]   -> H = 1
    N = 100
    discount_factor = 0.9
    max_history = 2  # only governs host-side history management, not forward math
    # TODO(synk): self.history pop/append bookkeeping is host-side Python list
    # state, not a tensor op — managed outside the kernel.
    hist0 = jax.nn.relu(jnp.linspace(-10.0, 10.0, N, dtype=jnp.float32))
    history_stack = hist0.reshape(1, N)

    # Deterministic example input
    key = jax.random.PRNGKey(0)
    ft_x = jax.random.normal(key, (N,), dtype=jnp.float32)

    def ref_loss(ft, hist_stack):
        # Pure-JAX reference matching the PyTorch reversed-iteration loop.
        loss = 0.0
        for i in range(hist_stack.shape[0]):
            h_i = hist_stack[::-1][i]
            loss = loss + (discount_factor ** (i + 1)) * jnp.mean((ft - h_i) ** 2)
        return loss

    # Case 1: H = 1 (module's initial state)
    loss1 = jax.block_until_ready(
        discounted_history_loss(ft_x, history_stack, discount_factor))
    assert jnp.allclose(loss1, ref_loss(ft_x, history_stack),
                        rtol=1e-5, atol=1e-5), (loss1, ref_loss(ft_x, history_stack))

    # Case 2: H = 2 (after one add_func), exercises the vectorized-H path
    key2 = jax.random.PRNGKey(1)
    older = jax.random.normal(key2, (N,), dtype=jnp.float32)
    history_stack2 = jnp.stack([older, hist0], axis=0)  # oldest-first
    loss2 = jax.block_until_ready(
        discounted_history_loss(ft_x, history_stack2, discount_factor))
    assert jnp.allclose(loss2, ref_loss(ft_x, history_stack2),
                        rtol=1e-5, atol=1e-5), (loss2, ref_loss(ft_x, history_stack2))

    print("KERNEL_OK")
</pallas_src>

<mosaic_0001>
module attributes {stable_mosaic.version = 11 : i64} {
  func.func @_discounted_mse_kernel(%arg0: memref<1x100xf32, #tpu.memory_space<vmem>>, %arg1: memref<1x100xf32, #tpu.memory_space<vmem>>, %arg2: memref<1x1xf32, #tpu.memory_space<smem>>) attributes {dimension_semantics = [], scalar_prefetch = 0 : i64, scratch_operands = 0 : i64, tpu.core_type = #tpu.core_type<tc>} {
    %c0 = arith.constant 0 : index
    %c0_0 = arith.constant 0 : index
    %0 = vector.load %arg1[%c0, %c0_0] : memref<1x100xf32, #tpu.memory_space<vmem>>, vector<1x100xf32>
    %c0_1 = arith.constant 0 : index
    %c0_2 = arith.constant 0 : index
    %1 = vector.load %arg0[%c0_1, %c0_2] : memref<1x100xf32, #tpu.memory_space<vmem>>, vector<1x100xf32>
    %2 = arith.subf %1, %0 : vector<1x100xf32>
    %3 = arith.mulf %2, %2 : vector<1x100xf32>
    %cst = arith.constant 0.899999976 : f32
    %4 = vector.broadcast %cst : f32 to vector<1x100xf32>
    %5 = arith.mulf %3, %4 : vector<1x100xf32>
    %6 = vector.shape_cast %5 : vector<1x100xf32> to vector<1x1x100xf32>
    %cst_3 = arith.constant dense<0.000000e+00> : vector<1xf32>
    %7 = vector.multi_reduction <add>, %6, %cst_3 [1, 2] : vector<1x1x100xf32> to vector<1xf32>
    %8 = vector.shape_cast %7 : vector<1xf32> to vector<1x1x1xf32>
    %9 = vector.extract %8[0, 0, 0] : f32 from vector<1x1x1xf32>
    %cst_4 = arith.constant 0.00999999977 : f32
    %10 = arith.mulf %9, %cst_4 : f32
    %c0_5 = arith.constant 0 : index
    %c0_6 = arith.constant 0 : index
    %11 = memref.load %arg2[%c0_5, %c0_6] : memref<1x1xf32, #tpu.memory_space<smem>>
    memref.store %10, %arg2[%c0_5, %c0_6] : memref<1x1xf32, #tpu.memory_space<smem>>
    return
  }
}

</mosaic_0001>

<bundles_post_ra>
// kernel: tpu_custom_call.1
= control target key start
LH: loop header
LB: loop body
LE: loop exit
PB: predicated region body
PF: predicated region fallthrough
CT: control target
= control target key end

     0   :  { %7 = vsyncpa [#allocation3], 0  ;;  %s141_s0 = inlined_call_operand.hbm [shape: f32[1,100], index: 0, kind: input, shape index: {}]   ;;  %s142_s1 = inlined_call_operand.vmem [shape: f32[1,100], index: 1, kind: input, shape index: {}]   ;;  %s143_s2 = inlined_call_operand.hbm [shape: f32[1,1], index: 2, kind: output, shape index: {}]  }
   0x1   :  { %8 = vsyncpa [#allocation4], 0  ;;  %s97_s9 = smov [#allocation2]   ;;  %s61_s13 = scalar_lea.hbm %s141_s0, 16 }
   0x2   :  { %s15_s10 = sshll.u32 %s97_s9, 4  ;;  %p62_p0 = scmp.ne.s32.totalorder %s141_s0, %s61_s13  ;;  %s16_s10 = int_to_ptr.vmem [resolvable:$true] %s15_s10 }
   0x3   :  { %p65_p1 = scmp.lt.u32.totalorder %s61_s13, %s141_s0 }
   0x5   :  { %p67_p2 = pnand %p65_p1, %p62_p0 }
   0x7   :  { %70 = shalt.err (!%p67_p2)
}
   0x8   :  { %s71_s18 = scalar_lea.vmem %s16_s10, 16  ;;  %s75_s19 = scalar_lea.vmem %s16_s10, 32 }
   0x9   :  { %p72_p3 = scmp.ne.s32.totalorder %s16_s10, %s71_s18  ;;  %p76_p4 = scmp.lt.s32.totalorder %s16_s10, %s16_s10 }
   0xa   :  { %p77_p5 = scmp.lt.s32.totalorder %s75_s19, %s71_s18 }
   0xc   :  { %p78_p6 = por %p77_p5, %p76_p4 }
   0xe   :  { %p79_p7 = pnand %p78_p6, %p72_p3 }
  0x10   :  { %82 = shalt.err (!%p79_p7)
}
  0x11   :  { %18 = dma.hbm_to_vmem [thread:$0]  %s141_s0, 16, %s16_s10, [#allocation3]  }
  0x12   :  { %93 = dma.done.wait [#allocation3], 16  }
  0x13   :  { %94 = vsyncadd [#allocation3], 4294967280  ;;  %v24_v0 = vld [vmem:[%s142_s1] sm:$0x1]  ;;  %vm29_vm0 = vcmask 811008   ;;  %s83_s26 = scalar_lea.hbm %s143_s2, 16 }
  0x14   :  { %v25_v1 = vld [vmem:[#allocation2] sm:$0x1]  ;;  %p84_p8 = scmp.ne.s32.totalorder %s143_s2, %s83_s26  ;;  %p87_p9 = scmp.lt.u32.totalorder %s83_s26, %s143_s2 }
  0x15   :  { %v26_v2 = vsub.f32 %v25_v1, %v24_v0 }
  0x16   :  { %p89_p10 = pnand %p87_p9, %p84_p8 }
  0x17   :  { %v27_v3 = vmul.f32 %v26_v2, %v26_v2 }
  0x19   :  { %v28_v4 = vmul.f32 0.9, %v27_v3 }
  0x1b   :  { %v30_v5 = vsel %vm29_vm0, %v28_v4, 0.0 }
  0x1c   :  { %31 = vadd.xlane.f32.xlu0 %v30_v5 }
  0xa9   :  { %v32_v6 = vpop.xlane.xlu0 %31 }
  0xaa   :  { %v33_v7 = vrot.slane %v32_v6, 4 }
  0xac   :  { %v34_v8 = vadd.f32 %v33_v7, %v32_v6 }
  0xae   :  { %v35_v9 = vrot.slane %v34_v8, 2 }
  0xb0   :  { %v36_v10 = vadd.f32 %v35_v9, %v34_v8 }
  0xb2   :  { %v37_v11 = vrot.slane %v36_v10, 1 }
  0xb4   :  { %v38_v12 = vadd.f32 %v37_v11, %v36_v10 }
  0xb6   :  { %57 = vpush %v38_v12 }
  0xe7   :  { %s58_s0 = spop %57 }
  0xe8   :  { %s40_s24 = smul.f32 0.01, %s58_s0 }
  0xea   :  { %42 = sst [smem:[#allocation5]] %s40_s24 }
  0xeb   :  { %92 = shalt.err (!%p89_p10)
}
  0xec   :  { %s98_s3 = smov [#allocation5]  }
  0xed   :  { %50 = dma.smem_to_hbm %s98_s3, 16, %s143_s2, [#allocation4]  }
  0xee   :  { %95 = dma.done.wait [#allocation4], 16  }
  0xef   :  { %96 = vsyncadd [#allocation4], 4294967280 }
  0xf0   :  { %54 = sfence }
  0xf1   :  { %55 = vsyncpa [#allocation3], 1 }
  0xf2   :  { %56 = vsyncpa [#allocation4], 1 }

</bundles_post_ra>
